<compile_context>
chip_gen: v7x
topology: tpu7x:2x2x1
jax: 0.10.0
libtpu: 0.0.40
codegen_flags: <defaults>
</compile_context>

<pallas_src>
import jax
import jax.numpy as jnp
from jax.experimental import pallas as pl
from jax.experimental.pallas import tpu as pltpu

_LANE = 128
_SUBLANE = 8


def _round_up(x, m):
    return ((x + m - 1) // m) * m


def _device_is_v7():
    try:
        kind = jax.devices()[0].device_kind.lower()
    except Exception:
        return False
    return ("v7" in kind) or ("7x" in kind)


def _pick_batch_tile(batch):
    """Biggest-tile-that-fits heuristic for the batch dimension."""
    b = _round_up(batch, _SUBLANE)
    if _device_is_v7():
        # v7x: 64 MiB VMEM -> smaller cap; 2 TCs -> prefer two grid steps
        # once the batch is big enough to split.
        cap = 1024
        if b <= cap:
            if b >= 256 and b % (2 * _SUBLANE) == 0:
                return b // 2
            return b
        return cap
    # v5e / v6e: 128 MiB VMEM, one TC.
    cap = 2048
    return b if b <= cap else cap


def _make_mlp_kernel(num_layers, non_linear, use_bias):
    """Kernel closure: whole MLP (matmuls + bias + ReLU) in one body."""

    def kernel(*refs):
        # refs = [z, w0, (b0), w1, (b1), ..., out]
        z_ref = refs[0]
        out_ref = refs[-1]
        params = refs[1:-1]

        x = z_ref[...]  # bf16 (tile, z_dim)
        idx = 0
        for layer in range(num_layers):
            w = params[idx][...]  # bf16 (in_dim, out_dim)
            idx += 1
            # bf16 x bf16 on the MXU, f32 accumulation.
            acc = jnp.dot(x, w, preferred_element_type=jnp.float32)
            if use_bias:
                acc = acc + params[idx][...]  # f32 (1, out_dim) broadcast add
                idx += 1
            last = layer == num_layers - 1
            if non_linear and not last:
                acc = jnp.maximum(acc, 0.0)
            if last:
                out_ref[...] = acc.astype(out_ref.dtype)
            else:
                x = acc.astype(jnp.bfloat16)  # next layer's MXU operand

    return kernel


def _tiled_call(kernel, args, out_shape, batch_tile, z_dim, out_dim_p,
                num_layers, use_bias, num_tiles):
    """Batch-tiled pallas_call (grid over the batch dimension only)."""

    in_specs = [pl.BlockSpec((batch_tile, z_dim), lambda i: (i, 0))]
    param_bytes = 0
    arg_i = 1
    for _ in range(num_layers):
        w = args[arg_i]
        arg_i += 1
        # Grid-invariant weight: full-array block, constant index_map.
        in_specs.append(pl.BlockSpec(w.shape, lambda i: (0, 0)))
        param_bytes += w.size * w.dtype.itemsize
        if use_bias:
            b = args[arg_i]
            arg_i += 1
            in_specs.append(pl.BlockSpec(b.shape, lambda i: (0, 0)))
            param_bytes += b.size * b.dtype.itemsize

    out_specs = pl.BlockSpec((batch_tile, out_dim_p), lambda i: (i, 0))

    # VMEM budget: double-buffered z/out tiles + double-buffered params
    # + 2x headroom, clamped well inside v7x's 64 MiB physical VMEM.
    io_bytes = 2 * (batch_tile * z_dim * 2 + batch_tile * out_dim_p * 4)
    vmem_limit = int(min(48 * 2**20,
                         max(16 * 2**20, 2 * (io_bytes + 2 * param_bytes))))

    return pl.pallas_call(
        kernel,
        out_shape=out_shape,
        grid=(num_tiles,),
        in_specs=in_specs,
        out_specs=out_specs,
        compiler_params=pltpu.CompilerParams(
            dimension_semantics=("parallel",),
            vmem_limit_bytes=vmem_limit,
        ),
    )(*args)


def decoder_forward(z, weights, biases, *, non_linear=True, batch_tile=None):
    """Decoder MLP forward pass as a Pallas TPU kernel.

    Args:
      z: (B, z_dim) latent input (any float dtype).
      weights: list of (in_dim, out_dim) weight matrices.
      biases: list of (out_dim,) bias vectors, or None if bias=False.
      non_linear: apply ReLU between hidden layers.
      batch_tile: rows per grid step (multiple of 8). None -> auto.

    Returns:
      (B, out_dim) float32 reconstruction.
    """
    B, z_dim = z.shape
    num_layers = len(weights)
    use_bias = biases is not None
    out_dim = weights[-1].shape[1]

    # ---- host-side operand prep: bf16 MXU operands, f32 biases -------------
    z_q = z.astype(jnp.bfloat16)
    w_q = [w.astype(jnp.bfloat16) for w in weights]
    b_2d = ([b.reshape(1, -1).astype(jnp.float32) for b in biases]
            if use_bias else None)

    # Lane-dense output guardrail: pad final out_dim up to a multiple of 128.
    out_dim_p = _round_up(out_dim, _LANE)
    if out_dim_p != out_dim:
        pad = out_dim_p - out_dim
        w_q[-1] = jnp.pad(w_q[-1], ((0, 0), (0, pad)))
        if use_bias:
            b_2d[-1] = jnp.pad(b_2d[-1], ((0, 0), (0, pad)))

    # Batch tiling + ragged-batch padding.
    if batch_tile is None:
        batch_tile = _pick_batch_tile(B)
    assert batch_tile % _SUBLANE == 0, "batch_tile must be a multiple of 8"
    B_p = _round_up(B, batch_tile)
    if B_p != B:
        z_q = jnp.pad(z_q, ((0, B_p - B), (0, 0)))
    num_tiles = B_p // batch_tile

    args = [z_q]
    for li in range(num_layers):
        args.append(w_q[li])
        if use_bias:
            args.append(b_2d[li])

    kernel = _make_mlp_kernel(num_layers, non_linear, use_bias)
    out_shape = jax.ShapeDtypeStruct((B_p, out_dim_p), jnp.float32)

    if num_tiles == 1:
        # Small batch: single invocation, no grid, everything in VMEM ->
        # zero pipeline/bookkeeping overhead.
        out = pl.pallas_call(kernel, out_shape=out_shape)(*args)
    else:
        out = _tiled_call(kernel, args, out_shape, batch_tile, z_dim,
                          out_dim_p, num_layers, use_bias, num_tiles)

    if B_p != B or out_dim_p != out_dim:
        out = out[:B, :out_dim]
    return out


# ---------------------------- references ------------------------------------
def _reference_forward_f32(z, weights, biases, non_linear):
    """Pure-f32 reference mirroring the PyTorch Decoder.forward."""
    x = z.astype(jnp.float32)
    n = len(weights)
    for i in range(n):
        x = x @ weights[i].astype(jnp.float32)
        if biases is not None:
            x = x + biases[i].astype(jnp.float32)
        if non_linear and i < n - 1:
            x = jnp.maximum(x, 0.0)
    return x


def _reference_forward_bf16(z, weights, biases, non_linear):
    """Reference mirroring the kernel numerics (bf16 operands, f32 accum)."""
    x = z.astype(jnp.bfloat16)
    n = len(weights)
    for i in range(n):
        acc = jnp.dot(x, weights[i].astype(jnp.bfloat16),
                      preferred_element_type=jnp.float32)
        if biases is not None:
            acc = acc + biases[i].astype(jnp.float32)
        if non_linear and i < n - 1:
            acc = jnp.maximum(acc, 0.0)
        x = acc if i == n - 1 else acc.astype(jnp.bfloat16)
    return x


if __name__ == "__main__":
    # Module configuration (synthetic, deterministic init):
    #   z_dim=8, hidden_layer_dim=[32, 64], input_dim=128, non_linear=True,
    #   bias=True  ->  layer_sizes = [8, 32, 64, 128]
    z_dim = 8
    hidden_layer_dim = [32, 64]
    input_dim = 128
    non_linear = True
    use_bias = True
    batch = 16

    layer_sizes = [z_dim] + hidden_layer_dim + [input_dim]

    key = jax.random.PRNGKey(0)
    keys = jax.random.split(key, 2 * (len(layer_sizes) - 1) + 2)

    weights = []
    biases = [] if use_bias else None
    for li, (d0, d1) in enumerate(zip(layer_sizes[:-1], layer_sizes[1:])):
        bound = 1.0 / (d0 ** 0.5)  # nn.Linear default fan-in scaling
        weights.append(jax.random.uniform(keys[2 * li], (d0, d1),
                                          jnp.float32, -bound, bound))
        if use_bias:
            biases.append(jax.random.uniform(keys[2 * li + 1], (d1,),
                                             jnp.float32, -bound, bound))

    # ---- small batch: single-invocation (no grid) path ----
    z = jax.random.normal(keys[-2], (batch, z_dim), jnp.float32)
    out = jax.block_until_ready(
        decoder_forward(z, weights, biases, non_linear=non_linear))
    assert out.shape == (batch, input_dim)
    ref_bf16 = _reference_forward_bf16(z, weights, biases, non_linear)
    ref_f32 = _reference_forward_f32(z, weights, biases, non_linear)
    assert jnp.allclose(out, ref_bf16, atol=2e-3, rtol=2e-3), "mismatch vs bf16 ref"
    assert jnp.allclose(out, ref_f32, atol=5e-2, rtol=5e-2), "mismatch vs f32 ref"

    # ---- larger batch: tiled batch-parallel path with a ragged last tile ----
    batch2 = 200
    z2 = jax.random.normal(keys[-1], (batch2, z_dim), jnp.float32)
    out2 = jax.block_until_ready(
        decoder_forward(z2, weights, biases, non_linear=non_linear,
                        batch_tile=64))
    assert out2.shape == (batch2, input_dim)
    ref2 = _reference_forward_bf16(z2, weights, biases, non_linear)
    assert jnp.allclose(out2, ref2, atol=2e-3, rtol=2e-3), "tiled path mismatch"

    # TODO(synk): hydra.utils.instantiate(self.dec_dist, x=x_rec) only wraps
    # x_rec in a distribution object (Default/Bernoulli with loc/logits =
    # x_rec); the tensor computed here is that wrapped value.

    print("KERNEL_OK")
</pallas_src>

<mosaic_0001>
module attributes {stable_mosaic.version = 11 : i64} {
  func.func @kernel(%arg0: memref<16x8xbf16, #tpu.memory_space<vmem>>, %arg1: memref<8x32xbf16, #tpu.memory_space<vmem>>, %arg2: memref<1x32xf32, #tpu.memory_space<vmem>>, %arg3: memref<32x64xbf16, #tpu.memory_space<vmem>>, %arg4: memref<1x64xf32, #tpu.memory_space<vmem>>, %arg5: memref<64x128xbf16, #tpu.memory_space<vmem>>, %arg6: memref<1x128xf32, #tpu.memory_space<vmem>>, %arg7: memref<16x128xf32, #tpu.memory_space<vmem>>) attributes {dimension_semantics = [], scalar_prefetch = 0 : i64, scratch_operands = 0 : i64, tpu.core_type = #tpu.core_type<tc>} {
    %c0 = arith.constant 0 : index
    %c0_0 = arith.constant 0 : index
    %0 = vector.load %arg0[%c0, %c0_0] : memref<16x8xbf16, #tpu.memory_space<vmem>>, vector<16x8xbf16>
    %c0_1 = arith.constant 0 : index
    %c0_2 = arith.constant 0 : index
    %1 = vector.load %arg1[%c0_1, %c0_2] : memref<8x32xbf16, #tpu.memory_space<vmem>>, vector<8x32xbf16>
    %cst = arith.constant dense<0.000000e+00> : vector<16x32xf32>
    %2 = tpu.matmul %0, %1, %cst {dimension_numbers = #tpu.dot_dimension_numbers<[1], [0], [0], [1], [0, 0, 1, 1], [], []>} : vector<16x8xbf16>, vector<8x32xbf16>, vector<16x32xf32> -> vector<16x32xf32>
    %c0_3 = arith.constant 0 : index
    %c0_4 = arith.constant 0 : index
    %3 = vector.load %arg2[%c0_3, %c0_4] : memref<1x32xf32, #tpu.memory_space<vmem>>, vector<1x32xf32>
    %4 = vector.broadcast %3 : vector<1x32xf32> to vector<16x32xf32>
    %5 = arith.addf %2, %4 : vector<16x32xf32>
    %cst_5 = arith.constant 0.000000e+00 : f32
    %6 = vector.broadcast %cst_5 : f32 to vector<16x32xf32>
    %7 = arith.maximumf %5, %6 : vector<16x32xf32>
    %8 = arith.truncf %7 : vector<16x32xf32> to vector<16x32xbf16>
    %c0_6 = arith.constant 0 : index
    %c0_7 = arith.constant 0 : index
    %9 = vector.load %arg3[%c0_6, %c0_7] : memref<32x64xbf16, #tpu.memory_space<vmem>>, vector<32x64xbf16>
    %cst_8 = arith.constant dense<0.000000e+00> : vector<16x64xf32>
    %10 = tpu.matmul %8, %9, %cst_8 {dimension_numbers = #tpu.dot_dimension_numbers<[1], [0], [0], [1], [0, 0, 1, 1], [], []>} : vector<16x32xbf16>, vector<32x64xbf16>, vector<16x64xf32> -> vector<16x64xf32>
    %c0_9 = arith.constant 0 : index
    %c0_10 = arith.constant 0 : index
    %11 = vector.load %arg4[%c0_9, %c0_10] : memref<1x64xf32, #tpu.memory_space<vmem>>, vector<1x64xf32>
    %12 = vector.broadcast %11 : vector<1x64xf32> to vector<16x64xf32>
    %13 = arith.addf %10, %12 : vector<16x64xf32>
    %cst_11 = arith.constant 0.000000e+00 : f32
    %14 = vector.broadcast %cst_11 : f32 to vector<16x64xf32>
    %15 = arith.maximumf %13, %14 : vector<16x64xf32>
    %16 = arith.truncf %15 : vector<16x64xf32> to vector<16x64xbf16>
    %c0_12 = arith.constant 0 : index
    %c0_13 = arith.constant 0 : index
    %17 = vector.load %arg5[%c0_12, %c0_13] : memref<64x128xbf16, #tpu.memory_space<vmem>>, vector<64x128xbf16>
    %cst_14 = arith.constant dense<0.000000e+00> : vector<16x128xf32>
    %18 = tpu.matmul %16, %17, %cst_14 {dimension_numbers = #tpu.dot_dimension_numbers<[1], [0], [0], [1], [0, 0, 1, 1], [], []>} : vector<16x64xbf16>, vector<64x128xbf16>, vector<16x128xf32> -> vector<16x128xf32>
    %c0_15 = arith.constant 0 : index
    %c0_16 = arith.constant 0 : index
    %19 = vector.load %arg6[%c0_15, %c0_16] : memref<1x128xf32, #tpu.memory_space<vmem>>, vector<1x128xf32>
    %20 = vector.broadcast %19 : vector<1x128xf32> to vector<16x128xf32>
    %21 = arith.addf %18, %20 : vector<16x128xf32>
    %c0_17 = arith.constant 0 : index
    %c0_18 = arith.constant 0 : index
    %22 = vector.load %arg7[%c0_17, %c0_18] : memref<16x128xf32, #tpu.memory_space<vmem>>, vector<16x128xf32>
    tpu.vector_store %arg7[%c0_17, %c0_18], %21 {strides = array<i32>} : memref<16x128xf32, #tpu.memory_space<vmem>>, vector<16x128xf32>,
    return
  }
}

</mosaic_0001>

<bundles_post_ra>
// kernel: tpu_custom_call.1
= control target key start
LH: loop header
LB: loop body
LE: loop exit
PB: predicated region body
PF: predicated region fallthrough
CT: control target
= control target key end

     0   :  { %12 = vsyncpa [#allocation3], 0  ;;  %s488_s0 = inlined_call_operand.vmem [shape: bf16[16,8], index: 0, kind: input, shape index: {}]   ;;  %s489_s1 = inlined_call_operand.vmem [shape: bf16[8,32], index: 1, kind: input, shape index: {}]   ;;  %s490_s2 = inlined_call_operand.vmem [shape: f32[1,32], index: 2, kind: input, shape index: {}]   ;;  %s491_s3 = inlined_call_operand.vmem [shape: bf16[32,64], index: 3, kind: input, shape index: {}]   ;;  %s492_s4 = inlined_call_operand.vmem [shape: f32[1,64], index: 4, kind: input, shape index: {}]   ;;  %s493_s5 = inlined_call_operand.hbm [shape: bf16[64,128], index: 5, kind: input, shape index: {}]   ;;  %s494_s6 = inlined_call_operand.vmem [shape: f32[1,128], index: 6, kind: input, shape index: {}]   ;;  %s495_s7 = inlined_call_operand.hbm [shape: f32[16,128], index: 7, kind: output, shape index: {}]  }
   0x1   :  { %13 = vsyncpa [#allocation4], 0  ;;  %s395_s24 = smov [#allocation2]   ;;  %s347_s28 = scalar_lea.hbm %s493_s5, 512 }
   0x2   :  { %s29_s25 = sshll.u32 %s395_s24, 4  ;;  %p348_p0 = scmp.ne.s32.totalorder %s493_s5, %s347_s28  ;;  %s30_s25 = int_to_ptr.vmem [resolvable:$true] %s29_s25 }
   0x3   :  { %p351_p1 = scmp.lt.u32.totalorder %s347_s28, %s493_s5 }
   0x5   :  { %p353_p2 = pnand %p351_p1, %p348_p0 }
   0x7   :  { %356 = shalt.err (!%p353_p2)
}
   0x8   :  { %s357_s10 = scalar_lea.vmem %s30_s25, 512  ;;  %p362_p4 = scmp.lt.s32.totalorder %s30_s25, %s30_s25 }
   0x9   :  { %p358_p3 = scmp.ne.s32.totalorder %s30_s25, %s357_s10  ;;  %p363_p5 = scmp.lt.s32.totalorder %s357_s10, %s357_s10 }
   0xb   :  { %p364_p6 = por %p363_p5, %p362_p4 }
   0xd   :  { %p365_p7 = pnand %p364_p6, %p358_p3 }
   0xf   :  { %368 = shalt.err (!%p365_p7)
}
  0x10   :  { %s396_s11 = smov 64   ;;  %s397_s12 = smov 4  }
  0x11   :  { %35 = dma.hbm_to_vmem [thread:$0]  %s493_s5, 512, %s30_s25, [#allocation3], %s396_s11, %s396_s11, %s397_s12  }
  0x12   :  { %391 = dma.done.wait [#allocation3], 512  }
  0x13   :  { %392 = vsyncadd [#allocation3], 4294966784  ;;  %v398_v0 = vmov 0.0   ;;  %vm399_vm0 = vmmov 0   ;;  %vm61_vm1 = vcmask 1043456   ;;  %v340_v3 = vld [vmem:[%s488_s0] sm:$0xff]  }
  0x14   :  { %306 = vmatprep.subr.bf16.mxu1 %v398_v0  ;;  %308 = vmatprep.mubr.msk.bf16.mxu1 %vm399_vm0, %v398_v0  ;;  %v44_v1 = vld [vmem:[%s489_s1] sm:$0xf]  ;;  %vm57_vm2 = vcmask 64512   ;;  %v342_v5 = vld [vmem:[%s491_s3 + $0x8] sm:$0xff]   ;;  %v343_v6 = vld [vmem:[#allocation2] sm:$0xff]   ;;  %vm132_vm3 = vcmask 261120  }
  0x15   :  { %320 = vmatprep.subr.bf16.mxu0 %v398_v0  ;;  %328 = vmatprep.mubr.msk.bf16.mxu0 %vm399_vm0, %v398_v0  ;;  %v63_v2 = vsel %vm61_vm1, %v44_v1, 0  ;;  %v341_v4 = vld [vmem:[%s491_s3] sm:$0xff]   ;;  %v344_v7 = vld [vmem:[#allocation2 + $0x8] sm:$0xff]   ;;  %v346_v19 = vld [vmem:[#allocation2 + $0x18] sm:$0xff]   ;;  %vm219_vm4 = vcmask 523264   ;;  %s400_s24 = smov [#allocation5]  }
  0x16   :  { %307 = vmatpush3.bf16.msra.mxu1 %v63_v2  ;;  %321 = vmatpush3.bf16.msra.mxu0 %v343_v6  ;;  %v283_v8 = vld [vmem:[%s490_s2] ss:$0 sm:$0xff]  ;;  %s271_s25 = sshll.u32 %s400_s24, 4  ;;  %s272_s25 = int_to_ptr.vmem [resolvable:$true] %s271_s25 }
  0x17   :  { %312 = vmatprep.subr.bf16.mxu1 %v398_v0  ;;  %322 = vmatprep.subr.bf16.mxu0 %v398_v0  ;;  %v345_v18 = vld [vmem:[#allocation2 + $0x10] sm:$0xff]   ;;  %p374_p9 = scmp.lt.s32.totalorder %s272_s25, %s272_s25 }
  0x18   :  { %v286_v20 = vld [vmem:[%s492_s4] ss:$0 sm:$0xff]  ;;  %s369_s4 = scalar_lea.vmem %s272_s25, 256 }
  0x19   :  { %309 = vmatmul.mubr.msk.bf16.vlgmr.msra.gmra.mrb[0].mxu1 %vm57_vm2, %v340_v3  ;;  %v290_v30 = vld [vmem:[%s494_s6] ss:$0 sm:$0xff]  ;;  %p370_p8 = scmp.ne.s32.totalorder %s272_s25, %s369_s4  ;;  %p375_p10 = scmp.lt.s32.totalorder %s369_s4, %s369_s4 }
  0x1a   :  { %316 = vmatprep.mubr.msk.bf16.mxu1 %vm399_vm0, %v398_v0  ;;  %313 = vmatpush3.bf16.msra.mxu1 %v341_v4 }
  0x1b   :  { %314 = vmatprep.subr.bf16.mxu1 %v398_v0  ;;  %323 = vmatpush3.bf16.msra.mxu0 %v344_v7  ;;  %p376_p11 = por %p375_p10, %p374_p9 }
  0x1c   :  { %324 = vmatprep.subr.bf16.mxu0 %v398_v0 }
  0x1d   :  { %p377_p12 = pnand %p376_p11, %p370_p8 }
  0x1e   :  { %315 = vmatpush3.bf16.msra.mxu1 %v342_v5 }
  0x1f   :  { %325 = vmatpush3.bf16.msra.mxu0 %v345_v18 }
  0x20   :  { %326 = vmatprep.subr.bf16.mxu0 %v398_v0 }
  0x23   :  { %327 = vmatpush3.bf16.msra.mxu0 %v346_v19 }
  0xec   :  { %v99_v9 = vpop.f32.mrb[0].mxu1 }
  0xed   :  { %v100_v10 = vadd.f32 %v283_v8, %v99_v9  ;;  %v310_v11 = vpop.f32.mrb[1].mxu1 }
  0xee   :  { %v102_v12 = vpop.f32.mrb[2].mxu1 }
  0xef   :  { %v103_v13 = vadd.f32 %v283_v8, %v102_v12  ;;  %v311_v14 = vpop.f32.mrb[3].mxu1  ;;  %v106_v15 = vmax.f32 %v100_v10, 0.0 }
  0xf1   :  { %v107_v16 = vmax.f32 %v103_v13, 0.0 }
  0xf3   :  { %v108_v17 = vpack.c.bf16 %v107_v16, %v106_v15 }
  0xf5   :  { %317 = vmatmul.mubr.msk.bf16.vlgmr.msra.gmra.mrb[4].mxu1 %vm132_vm3, %v108_v17 }
 0x1c8   :  { %v170_v21 = vpop.f32.mrb[4].mxu1 }
 0x1c9   :  { %v171_v22 = vadd.f32 %v286_v20, %v170_v21  ;;  %v318_v23 = vpop.f32.mrb[5].mxu1 }
 0x1ca   :  { %v173_v24 = vpop.f32.mrb[6].mxu1 }
 0x1cb   :  { %v174_v25 = vadd.f32 %v286_v20, %v173_v24  ;;  %v319_v26 = vpop.f32.mrb[7].mxu1  ;;  %v177_v27 = vmax.f32 %v171_v22, 0.0 }
 0x1cd   :  { %v178_v28 = vmax.f32 %v174_v25, 0.0 }
 0x1cf   :  { %v179_v29 = vpack.c.bf16 %v178_v28, %v177_v27 }
 0x1d1   :  { %329 = vmatmul.mubr.msk.bf16.vlgmr.msra.gmra.mrb[0].mxu0 %vm219_vm4, %v179_v29 }
 0x2a4   :  { %v257_v31 = vpop.f32.mrb[0].mxu0 }
 0x2a5   :  { %v258_v32 = vadd.f32 %v290_v30, %v257_v31  ;;  %v330_v33 = vpop.f32.mrb[1].mxu0 }
 0x2a6   :  { %v260_v34 = vpop.f32.mrb[2].mxu0 }
 0x2a7   :  { %264 = vst [vmem:[#allocation5] sm:$0xff] %v258_v32  ;;  %v261_v35 = vadd.f32 %v290_v30, %v260_v34  ;;  %v331_v36 = vpop.f32.mrb[3].mxu0 }
 0x2a9   :  { %265 = vst [vmem:[#allocation5 + $0x8] sm:$0xff] %v261_v35 }
 0x2aa   :  { %380 = shalt.err (!%p377_p12)
}
 0x2ab   :  { %s381_s27 = scalar_lea.hbm %s495_s7, 256 }
 0x2ac   :  { %p382_p13 = scmp.ne.s32.totalorder %s495_s7, %s381_s27  ;;  %p385_p0 = scmp.lt.u32.totalorder %s381_s27, %s495_s7 }
 0x2ae   :  { %p387_p1 = pnand %p385_p0, %p382_p13 }
 0x2b0   :  { %390 = shalt.err (!%p387_p1)
}
 0x2b1   :  { %s401_s9 = smov 128   ;;  %s402_s10 = smov 8  }
 0x2b2   :  { %277 = dma.vmem_to_hbm [thread:$0]  %s272_s25, 256, %s495_s7, [#allocation4], %s401_s9, %s401_s9, %s402_s10  }
 0x2b3   :  { %393 = dma.done.wait [#allocation4], 256  }
 0x2b4   :  { %394 = vsyncadd [#allocation4], 4294967040 }
 0x2b5   :  { %281 = vsyncpa [#allocation3], 1 }
 0x2b6   :  { %282 = vsyncpa [#allocation4], 1 }

</bundles_post_ra>
